<compile_context>
chip_gen: v5e
topology: v5e:2x2
jax: 0.10.0
libtpu: 0.0.40
codegen_flags: <defaults>
</compile_context>

<pallas_src>
import math
from functools import partial

import jax
import jax.numpy as jnp
from jax.experimental import pallas as pl
from jax.experimental.pallas import tpu as pltpu


# ----------------------------- Pallas kernel ---------------------------------

def _rmsnorm_kernel(x_ref, w_ref, o_ref, *, eps, inv_d):
    # x_ref: (tm, Dp) tile; w_ref: (1, Dp) resident weight; o_ref: (tm, Dp)
    x = x_ref[...].astype(jnp.float32)              # stats in f32 (.float())
    ss = jnp.sum(x * x, axis=-1, keepdims=True)     # padded lanes are zero
    inv = jax.lax.rsqrt(ss * inv_d + eps)           # true mean over real D; EUP rsqrt
    normed = (x * inv).astype(o_ref.dtype)          # .type_as(x)
    o_ref[...] = normed * w_ref[...]                # weight already in x.dtype


# ------------------------------ tiling helpers --------------------------------

def _round_up(a, b):
    return (a + b - 1) // b * b


def _choose_row_tile(m, d_pad, itemsize, target_block_bytes=2 << 20, max_rows=2048):
    """Bytes-targeted row tile, rounded to the packed-dtype sublane multiple."""
    sub = max(8, 32 // itemsize)                 # 8 (f32) / 16 (bf16) / 32 (int8/fp8)
    row_bytes = d_pad * itemsize
    tm = max(sub, (target_block_bytes // row_bytes) // sub * sub)
    tm = min(tm, max_rows)
    tm = min(tm, _round_up(m, sub))              # never larger than the row count
    return int(tm)


# ------------------------------- wrapper ---------------------------------------

def pallas_rmsnorm(x, weight, eps=1e-5):
    """RMSNorm over the last axis. x: (..., D), weight: (D,)."""
    orig_shape = x.shape
    D = orig_shape[-1]
    M = math.prod(orig_shape[:-1]) if len(orig_shape) > 1 else 1

    # Match the module with weight stored in x.dtype: output.type_as(x) * weight.
    # TODO(synk): if weight is kept in f32 while x is bf16, PyTorch promotes the
    # final multiply to f32; here the weight is folded down to x.dtype instead.
    w = weight.astype(x.dtype)

    x2 = x.reshape(M, D)

    # Lane-dense last dim: pad D up to a multiple of 128. Padded lanes are zero,
    # are excluded from the mean via the true 1/D factor, and are sliced off.
    Dp = _round_up(max(D, 128), 128)
    if Dp != D:
        x2 = jnp.pad(x2, ((0, 0), (0, Dp - D)))
        w = jnp.pad(w, (0, Dp - D))
    w2 = w.reshape(1, Dp)

    itemsize = jnp.dtype(x.dtype).itemsize
    tm = _choose_row_tile(M, Dp, itemsize)
    grid = (pl.cdiv(M, tm),)                     # edge block padded by Pallas;
                                                 # per-row reduction -> padding is inert

    # VMEM budget: double-buffered in+out blocks, resident weight, f32 temporaries.
    blk_bytes = tm * Dp * itemsize
    f32_bytes = tm * Dp * 4
    needed = 4 * blk_bytes + 3 * f32_bytes + 2 * Dp * itemsize + (2 << 20)
    vmem_limit = int(min(max(needed, 32 << 20), 48 << 20))

    out = pl.pallas_call(
        partial(_rmsnorm_kernel, eps=eps, inv_d=1.0 / D),
        out_shape=jax.ShapeDtypeStruct((M, Dp), x.dtype),
        grid=grid,
        in_specs=[
            pl.BlockSpec((tm, Dp), lambda i: (i, 0)),   # row tile of x
            pl.BlockSpec((1, Dp), lambda i: (0, 0)),    # weight, resident in VMEM
        ],
        out_specs=pl.BlockSpec((tm, Dp), lambda i: (i, 0)),
        compiler_params=pltpu.CompilerParams(
            dimension_semantics=("parallel",),          # megacore shards rows on v7x
            vmem_limit_bytes=vmem_limit,
        ),
    )(x2, w2)

    if Dp != D:
        out = out[:, :D]
    return out.reshape(orig_shape)


# ----------------------------- JAX reference -----------------------------------

def reference_rmsnorm(x, weight, eps=1e-5):
    xf = x.astype(jnp.float32)
    normed = xf * jax.lax.rsqrt(jnp.mean(xf * xf, axis=-1, keepdims=True) + eps)
    return (normed.astype(x.dtype) * weight.astype(x.dtype)).astype(x.dtype)


# ----------------------------------- main ---------------------------------------

if __name__ == "__main__":
    eps = 1e-5
    key = jax.random.PRNGKey(0)
    k_x, k_w, k_x2, k_w2 = jax.random.split(key, 4)

    # Primary check: shapes implied by the module (batch=2, seq=8, hidden=32).
    B, S, dim = 2, 8, 32
    x = jax.random.normal(k_x, (B, S, dim), jnp.float32)
    weight = jnp.ones((dim,), jnp.float32) + 0.1 * jax.random.normal(k_w, (dim,), jnp.float32)

    out = pallas_rmsnorm(x, weight, eps=eps)
    out = jax.block_until_ready(out)
    ref = reference_rmsnorm(x, weight, eps=eps)
    assert out.shape == x.shape and out.dtype == x.dtype
    assert jnp.allclose(out, ref, atol=1e-5, rtol=1e-5), "mismatch vs. JAX reference (primary)"

    # Secondary check: ragged row count (M % 8 != 0) and D % 128 != 0 to exercise
    # the cdiv edge block and the lane padding path.
    x_r = jax.random.normal(k_x2, (5, 7, 160), jnp.float32)
    w_r = jnp.ones((160,), jnp.float32) + 0.1 * jax.random.normal(k_w2, (160,), jnp.float32)
    out_r = jax.block_until_ready(pallas_rmsnorm(x_r, w_r, eps=eps))
    ref_r = reference_rmsnorm(x_r, w_r, eps=eps)
    assert jnp.allclose(out_r, ref_r, atol=1e-5, rtol=1e-5), "mismatch vs. JAX reference (ragged)"

    print("KERNEL_OK")
</pallas_src>

<mosaic_0001>
module attributes {stable_mosaic.version = 11 : i64} {
  func.func @_rmsnorm_kernel(%arg0: i32, %arg1: memref<16x128xf32, #tpu.memory_space<vmem>>, %arg2: memref<1x128xf32, #tpu.memory_space<vmem>>, %arg3: memref<16x128xf32, #tpu.memory_space<vmem>>) attributes {dimension_semantics = [#tpu.dimension_semantics<parallel>], iteration_bounds = array<i64: 1>, scalar_prefetch = 0 : i64, scratch_operands = 0 : i64, tpu.core_type = #tpu.core_type<tc>, window_params = [{transform_indices = @transform_0, window_bounds = array<i64: 16, 128>}, {pipeline_mode = #tpu.pipeline_mode<synchronous>, transform_indices = @transform_1, window_bounds = array<i64: 1, 128>}, {transform_indices = @transform_2, window_bounds = array<i64: 16, 128>}]} {
    %c0 = arith.constant 0 : index
    %c0_0 = arith.constant 0 : index
    %0 = vector.load %arg1[%c0, %c0_0] : memref<16x128xf32, #tpu.memory_space<vmem>>, vector<16x128xf32>
    %1 = arith.mulf %0, %0 : vector<16x128xf32>
    %cst = arith.constant dense<0.000000e+00> : vector<16xf32>
    %2 = vector.multi_reduction <add>, %1, %cst [1] : vector<16x128xf32> to vector<16xf32>
    %3 = vector.shape_cast %2 : vector<16xf32> to vector<16x1xf32>
    %cst_1 = arith.constant 3.125000e-02 : f32
    %4 = vector.broadcast %cst_1 : f32 to vector<16x1xf32>
    %5 = arith.mulf %3, %4 : vector<16x1xf32>
    %cst_2 = arith.constant 9.99999974E-6 : f32
    %6 = vector.broadcast %cst_2 : f32 to vector<16x1xf32>
    %7 = arith.addf %5, %6 : vector<16x1xf32>
    %8 = math.rsqrt %7 : vector<16x1xf32>
    %9 = vector.broadcast %8 : vector<16x1xf32> to vector<16x128xf32>
    %10 = arith.mulf %0, %9 : vector<16x128xf32>
    %c0_3 = arith.constant 0 : index
    %c0_4 = arith.constant 0 : index
    %11 = vector.load %arg2[%c0_3, %c0_4] : memref<1x128xf32, #tpu.memory_space<vmem>>, vector<1x128xf32>
    %12 = vector.broadcast %11 : vector<1x128xf32> to vector<16x128xf32>
    %13 = arith.mulf %10, %12 : vector<16x128xf32>
    %c0_5 = arith.constant 0 : index
    %c0_6 = arith.constant 0 : index
    %14 = vector.load %arg3[%c0_5, %c0_6] : memref<16x128xf32, #tpu.memory_space<vmem>>, vector<16x128xf32>
    tpu.vector_store %arg3[%c0_5, %c0_6], %13 {strides = array<i32>} : memref<16x128xf32, #tpu.memory_space<vmem>>, vector<16x128xf32>,
    return
  }
  func.func @transform_0(%arg0: i32) -> (i32, i32) {
    %c0_i32 = arith.constant 0 : i32
    %c0_i32_0 = arith.constant 0 : i32
    return %arg0, %c0_i32 : i32, i32
  }
  func.func @transform_1(%arg0: i32) -> (i32, i32) {
    %c0_i32 = arith.constant 0 : i32
    %c0_i32_0 = arith.constant 0 : i32
    %c0_i32_1 = arith.constant 0 : i32
    return %c0_i32, %c0_i32_0 : i32, i32
  }
  func.func @transform_2(%arg0: i32) -> (i32, i32) {
    %c0_i32 = arith.constant 0 : i32
    %c0_i32_0 = arith.constant 0 : i32
    return %arg0, %c0_i32 : i32, i32
  }
}

</mosaic_0001>

<bundles_post_ra>
// kernel: tpu_custom_call.1
= control target key start
LH: loop header
LB: loop body
LE: loop exit
PB: predicated region body
PF: predicated region fallthrough
CT: control target
= control target key end

     0   :  { %7 = vsyncpa [#allocation3], 0  ;;  %s227_s0 = inlined_call_operand.hbm [shape: f32[16,128], index: 0, kind: input, shape index: {}]   ;;  %s228_s1 = inlined_call_operand.hbm [shape: f32[1,128], index: 1, kind: input, shape index: {}]   ;;  %s229_s2 = inlined_call_operand.hbm [shape: f32[16,128], index: 2, kind: output, shape index: {}]  }
   0x1   :  { %8 = vsyncpa [#allocation6], 0 }
   0x2   :  { %9 = vsyncpa [#allocation4], 0  ;;  %s14_s11 = sshll.u32 %s227_s0, 4  ;;  %s192_s12 = smov [#allocation2]   ;;  %s15_s11 = int_to_ptr.hbm [resolvable:$true] %s14_s11 }
   0x3   :  { %s16_s13 = sshll.u32 %s192_s12, 4  ;;  %s28_s16 = sshll.u32 %s228_s1, 4  ;;  %s17_s13 = int_to_ptr.vmem [resolvable:$true] %s16_s13  ;;  %s29_s16 = int_to_ptr.hbm [resolvable:$true] %s28_s16 }
   0x4   :  { %s193_s17 = smov 128   ;;  %s194_s18 = smov 8  }
   0x5   :  { %22 = dma.hbm_to_vmem [thread:$0]  %s15_s11, 256, %s17_s13, [#allocation3], %s193_s17, %s193_s17, %s194_s18  }
   0x6   :  { %s195_s19 = smov [#allocation5]  }
   0x7   :  { %s30_s20 = sshll.u32 %s195_s19, 4  ;;  %s31_s20 = int_to_ptr.vmem [resolvable:$true] %s30_s20 }
   0x8   :  { %33 = dma.hbm_to_vmem [thread:$0]  %s29_s16, 16, %s31_s20, [#allocation6]  }
   0x9   :  { %186 = dma.done.wait [#allocation3], 256  }
   0xa   :  { %187 = vsyncadd [#allocation3], 4294967040 }
   0xb   :  { %188 = dma.done.wait [#allocation6], 16  }
   0xc   :  { %189 = vsyncadd [#allocation6], 4294967280  ;;  %v42_v0 = vld [vmem:[#allocation2] sm:$0xff]  ;;  %v43_v2 = vld [vmem:[#allocation2 + $0x8] sm:$0xff]  ;;  %s196_s0 = smov [#allocation7]   ;;  %s90_s23 = sshll.u32 %s229_s2, 4  ;;  %s91_s23 = int_to_ptr.hbm [resolvable:$true] %s90_s23 }
   0xd   :  { %v44_v1 = vmul.f32 %v42_v0, %v42_v0  ;;  %v45_v3 = vmul.f32 %v43_v2, %v43_v2  ;;  %v109_v18 = vld [vmem:[#allocation5] ss:$0 sm:$0xff]  ;;  %s88_s1 = sshll.u32 %s196_s0, 4  ;;  %s89_s1 = int_to_ptr.vmem [resolvable:$true] %s88_s1 }
   0xf   :  { %46 = vadd.xlane.f32.xlu0 %v44_v1 }
  0x17   :  { %48 = vadd.xlane.f32.xlu0 %v45_v3 }
  0x82   :  { %v47_v4 = vpop.xlane.xlu0 %46 }
  0x83   :  { %v50_v5 = vmul.f32 0.03125, %v47_v4 }
  0x85   :  { %v52_v6 = vadd.f32 1e-05, %v50_v5 }
  0x87   :  { %110 = vrsqrt.f32 %v52_v6  ;;  %vm60_vm1 = vweird.f32 %v52_v6 }
  0x8a   :  { %v49_v7 = vpop.xlane.xlu0 %48 }
  0x8b   :  { %v51_v8 = vmul.f32 0.03125, %v49_v7 }
  0x8d   :  { %v111_v9 = vpop.eup %110  ;;  %v53_v10 = vadd.f32 1e-05, %v51_v8 }
  0x8e   :  { %v55_v11 = vmul.f32 %v111_v9, %v52_v6  ;;  %vm61_vm0 = vweird.f32 %v111_v9 }
  0x8f   :  { %112 = vrsqrt.f32 %v53_v10  ;;  %vm62_vm2 = vmor %vm60_vm1, %vm61_vm0  ;;  %vm70_vm4 = vweird.f32 %v53_v10 }
  0x90   :  { %v56_v12 = vmul.f32 %v111_v9, %v55_v11 }
  0x92   :  { %v57_v13 = vmul.f32 0.5, %v56_v12 }
  0x94   :  { %v58_v14 = vsub.f32 1.5, %v57_v13 }
  0x95   :  { %v113_v15 = vpop.eup %112 }
  0x96   :  { %v59_v16 = vmul.f32 %v111_v9, %v58_v14  ;;  %v65_v17 = vmul.f32 %v113_v15, %v53_v10  ;;  %vm71_vm3 = vweird.f32 %v113_v15 }
  0x97   :  { %vm72_vm5 = vmor %vm70_vm4, %vm71_vm3 }
  0x98   :  { %v63_v19 = vsel %vm62_vm2, %v111_v9, %v59_v16  ;;  %v66_v20 = vmul.f32 %v113_v15, %v65_v17 }
  0x99   :  { %v74_v21 = vmul.f32 %v63_v19, %v42_v0 }
  0x9a   :  { %v67_v22 = vmul.f32 0.5, %v66_v20 }
  0x9b   :  { %v80_v23 = vmul.f32 %v109_v18, %v74_v21 }
  0x9c   :  { %v68_v24 = vsub.f32 1.5, %v67_v22 }
  0x9d   :  { %82 = vst [vmem:[#allocation7] sm:$0xff] %v80_v23 }
  0x9e   :  { %v69_v25 = vmul.f32 %v113_v15, %v68_v24 }
  0xa0   :  { %v73_v26 = vsel %vm72_vm5, %v113_v15, %v69_v25 }
  0xa1   :  { %v75_v27 = vmul.f32 %v73_v26, %v43_v2 }
  0xa3   :  { %v81_v28 = vmul.f32 %v109_v18, %v75_v27 }
  0xa5   :  { %83 = vst [vmem:[#allocation7 + $0x8] sm:$0xff] %v81_v28 }
  0xa6   :  { %96 = dma.vmem_to_hbm [thread:$0]  %s89_s1, 256, %s91_s23, [#allocation4], %s193_s17, %s193_s17, %s194_s18  }
  0xa7   :  { %190 = dma.done.wait [#allocation4], 256  }
  0xa8   :  { %191 = vsyncadd [#allocation4], 4294967040 }
  0xa9   :  { %101 = vsyncpa [#allocation3], 1 }
  0xaa   :  { %102 = vsyncpa [#allocation6], 1 }
  0xab   :  { %103 = vsyncpa [#allocation4], 1 }

</bundles_post_ra>
